<compile_context>
chip_gen: v6e
topology: v6e:2x2x1
jax: 0.10.0
libtpu: 0.0.40
codegen_flags: <defaults>
</compile_context>

<pallas_src>
import jax
import jax.numpy as jnp
import numpy as np
from jax import lax
from jax.experimental import pallas as pl
from jax.experimental.pallas import tpu as pltpu


# ----------------------------------------------------------------------------
# Pallas kernel: fused attention-score + classifier projection, masked softmax
# pooling, compact (Bt, O) output.
# ----------------------------------------------------------------------------
def _attn_classifier_kernel(seq_ref,    # VMEM (Bt, T, H)   f32 per-visit hidden states
                            lens_ref,   # VMEM (Bt, 1)      i32 valid-visit counts
                            wf_ref,     # VMEM (H, F_pad)   fused weight: [0,O)=classifier, O=score
                            bc_ref,     # VMEM (1, O)       classifier bias
                            out_ref):   # VMEM (Bt, O)      compact output
    seq = seq_ref[...]                                       # (Bt, T, H) f32
    Bt, T, H = seq.shape
    O = out_ref.shape[-1]
    F = wf_ref.shape[-1]

    # --- single fused MXU pass: class projections (cols [0,O)) + score logits (col O) ---
    proj = jnp.dot(seq.reshape(Bt * T, H), wf_ref[...],
                   preferred_element_type=jnp.float32).reshape(Bt, T, F)   # (Bt, T, F)

    # Extract the score column via select + lane-reduce (adding exact zeros), which keeps the
    # lowering on the proven lane-reduce path and avoids a lane->sublane relayout; this work is
    # filler hidden under the HBM DMA.
    col = lax.broadcasted_iota(jnp.int32, (1, 1, F), 2)
    vu = jnp.sum(jnp.where(col == O, proj, jnp.float32(0.0)), axis=-1)     # (Bt, T)
    # NOTE: bd @ u^T is a per-logit constant; softmax shift-invariance makes it exactly a no-op.

    # Validity mask built once per block: visit index < lens[b].
    idx = lax.broadcasted_iota(jnp.int32, (Bt, T), 1)
    vu = jnp.where(idx < lens_ref[...], vu, jnp.float32(-1e30))

    # Masked softmax, kept unnormalized here; normalization happens once on the (Bt, O) result.
    m = jnp.max(vu, axis=-1, keepdims=True)                                # (Bt, 1)
    p = jnp.exp(vu - m)                                                    # (Bt, T)
    denom = jnp.sum(p, axis=-1, keepdims=True)                             # (Bt, 1)

    # Attention pooling of the pre-projected class columns (width O, not H).
    pooled = jnp.einsum('bqt,btf->bqf', p[:, None, :], proj,
                        preferred_element_type=jnp.float32)[:, 0, :]       # (Bt, F)

    # --- Classifier: dropout is identity in eval mode; activation=None ---
    out_ref[...] = pooled[:, :O] / denom + bc_ref[...]                     # (Bt, O) compact store


def _choose_chunk(B, cap=512):
    """Pick the patient-chunk size Bt and (possibly padded) batch B_pad.

    Prefers a multiple-of-8 divisor of B (no padding pass over the dominant (B,T,H) stream)
    and, for B >= 16, at least two grid programs so v7x's two TensorCores both get work.
    cap=512 keeps the lane-padded seq block plus the fused projection intermediate well under
    even v5e's 16 MiB default scoped-VMEM limit while still being a >= 1 MiB tile.
    """
    if B >= 16:
        cap = min(cap, B // 2)
    cap = max(8, (cap // 8) * 8)
    for bt in range(cap, 7, -8):
        if B % bt == 0:
            return bt, B                         # exact divisor: no padding of seq_hidden
    bt = min(cap, -(-B // 8) * 8)                # rare fallback (B not a multiple of 8)
    return bt, -(-B // bt) * bt


def attention_classifier(seq_hidden, lens, wd, bd, u, wc, bc):
    """seq_hidden: (B, T, H) f32, lens: (B,) int -> (B, O) f32."""
    B, T, H = seq_hidden.shape
    A = wd.shape[1]
    O = wc.shape[1]
    F_pad = 128   # lane-dense fused weight width

    # Fold the attention context vector into the dense weight and fuse with the classifier:
    #   cols [0, O) = wc, col O = wd @ u^T, remaining lanes zero.
    w_score = (wd.astype(jnp.float32) @ u.astype(jnp.float32).reshape(A, 1))[:, 0]   # (H,)
    wf = jnp.zeros((H, F_pad), jnp.float32).at[:, :O].set(wc.astype(jnp.float32))
    wf = wf.at[:, O].set(w_score)
    bc2 = bc.reshape(1, O).astype(jnp.float32)
    # bd is intentionally unused here: bd @ u^T only shifts every logit by the same constant,
    # which the softmax removes exactly.

    Bt, B_pad = _choose_chunk(B)
    if B_pad != B:   # only when B is not a multiple of 8 (extra HBM pass avoided otherwise)
        seq_hidden = jnp.pad(seq_hidden, ((0, B_pad - B), (0, 0), (0, 0)))
        lens = jnp.pad(lens, (0, B_pad - B))
    lens2d = lens.astype(jnp.int32).reshape(B_pad, 1)

    grid = (B_pad // Bt,)
    grid_spec = pltpu.PrefetchScalarGridSpec(
        num_scalar_prefetch=0,
        grid=grid,
        in_specs=[
            pl.BlockSpec((Bt, T, H), lambda i: (i, 0, 0)),     # per-chunk hidden states
            pl.BlockSpec((Bt, 1), lambda i: (i, 0)),           # per-chunk visit counts
            # Weights/bias: constant index_map -> DMA'd once, VMEM-resident across all chunks.
            pl.BlockSpec((H, F_pad), lambda i: (0, 0)),
            pl.BlockSpec((1, O), lambda i: (0, 0)),
        ],
        out_specs=pl.BlockSpec((Bt, O), lambda i: (i, 0)),     # compact output, no padded slab
    )

    cost = pl.CostEstimate(
        flops=2 * B_pad * T * H * F_pad + 2 * B_pad * T * F_pad,
        transcendentals=B_pad * T,
        bytes_accessed=(B_pad * T * H + B_pad + H * F_pad + O + B_pad * O) * 4,
    )

    out = pl.pallas_call(
        _attn_classifier_kernel,
        out_shape=jax.ShapeDtypeStruct((B_pad, O), jnp.float32),
        grid_spec=grid_spec,
        compiler_params=pltpu.CompilerParams(dimension_semantics=("parallel",)),
        cost_estimate=cost,
    )(seq_hidden.astype(jnp.float32), lens2d, wf, bc2)

    return out[:B] if B_pad != B else out


# ----------------------------------------------------------------------------
# Plain-JAX reference (for correctness check of the kernel)
# ----------------------------------------------------------------------------
def reference(seq_hidden, lens, wd, bd, u, wc, bc):
    B, T, H = seq_hidden.shape
    t = seq_hidden @ wd + bd                                   # (B, T, A)
    vu = jnp.sum(t * u, axis=-1)                               # (B, T)
    mask = jnp.arange(T)[None, :] < lens[:, None]
    vu = jnp.where(mask, vu, -1e30)
    score = jax.nn.softmax(vu, axis=-1)                        # (B, T)
    pooled = jnp.einsum("bt,bth->bh", score, seq_hidden)       # (B, H)
    return pooled @ wc + bc[0]                                 # (B, O)


# ----------------------------------------------------------------------------
# Main
# ----------------------------------------------------------------------------
if __name__ == "__main__":
    # Small, module-consistent sizes.
    B = 8                 # number of patients
    T = 8                 # max visits per patient
    code_num = 16
    code_size = 16
    graph_size = 16
    hidden_size = 32
    attention_size = 32   # DotProductAttention(hidden_size, 32)
    output_size = 8
    dropout_rate = 0.0    # eval-mode dropout is identity anyway
    # activation = None

    key = jax.random.PRNGKey(0)
    k_cx, k_div, k_nb, k_seq, k_wd, k_bd, k_u, k_wc, k_bc = jax.random.split(key, 9)

    # Module inputs (documented shapes; the upstream layers consuming them are TODO above).
    code_x = (jax.random.uniform(k_cx, (B, T, code_num)) < 0.3).astype(jnp.float32)
    divided = (jax.random.uniform(k_div, (B, T, code_num, 3)) < 0.3).astype(jnp.float32)
    neighbors = (jax.random.uniform(k_nb, (B, T, code_num)) < 0.3).astype(jnp.float32)
    lens = jnp.array([8, 5, 3, 1, 8, 2, 7, 4], dtype=jnp.int32)

    # TODO(synk): per-timestep hidden states (output of TransitionLayer) synthesized here because
    # EmbeddingLayerSingleEmbedding / GraphLayerSingleEmbedding / TransitionLayer were not provided.
    seq_hidden = jax.random.normal(k_seq, (B, T, hidden_size), dtype=jnp.float32)

    # Deterministic parameter init (PyTorch-like uniform scaling).
    def uinit(k, shape, fan_in):
        bound = 1.0 / np.sqrt(fan_in)
        return jax.random.uniform(k, shape, jnp.float32, -bound, bound)

    wd = uinit(k_wd, (hidden_size, attention_size), hidden_size)   # attention dense weight (H, A)
    bd = uinit(k_bd, (1, attention_size), hidden_size)             # attention dense bias
    u = uinit(k_u, (1, attention_size), attention_size)            # attention context vector
    wc = uinit(k_wc, (hidden_size, output_size), hidden_size)      # classifier Linear weight (H, O)
    bc = uinit(k_bc, (1, output_size), hidden_size)                # classifier Linear bias

    out = attention_classifier(seq_hidden, lens, wd, bd, u, wc, bc)
    out = jax.block_until_ready(out)

    ref = reference(seq_hidden, lens, wd, bd, u, wc, bc)
    # Fusing u (and wc) into a single weight changes floating-point summation order only.
    np.testing.assert_allclose(np.asarray(out), np.asarray(ref), rtol=1e-4, atol=1e-5)

    assert out.shape == (B, output_size)
    print("KERNEL_OK")
</pallas_src>

<mosaic_0001>
module attributes {stable_mosaic.version = 11 : i64} {
  func.func @_attn_classifier_kernel(%arg0: i32, %arg1: memref<8x8x32xf32, #tpu.memory_space<vmem>>, %arg2: memref<8x1xi32, #tpu.memory_space<vmem>>, %arg3: memref<32x128xf32, #tpu.memory_space<vmem>>, %arg4: memref<1x8xf32, #tpu.memory_space<vmem>>, %arg5: memref<8x8xf32, #tpu.memory_space<vmem>>) attributes {dimension_semantics = [#tpu.dimension_semantics<parallel>], iteration_bounds = array<i64: 1>, scalar_prefetch = 0 : i64, scratch_operands = 0 : i64, tpu.core_type = #tpu.core_type<tc>, window_params = [{transform_indices = @transform_0, window_bounds = array<i64: 8, 8, 32>}, {transform_indices = @transform_1, window_bounds = array<i64: 8, 1>}, {pipeline_mode = #tpu.pipeline_mode<synchronous>, transform_indices = @transform_2, window_bounds = array<i64: 32, 128>}, {pipeline_mode = #tpu.pipeline_mode<synchronous>, transform_indices = @transform_3, window_bounds = array<i64: 1, 8>}, {transform_indices = @transform_4, window_bounds = array<i64: 8, 8>}]} {
    %c0 = arith.constant 0 : index
    %c0_0 = arith.constant 0 : index
    %c0_1 = arith.constant 0 : index
    %0 = vector.load %arg1[%c0, %c0_0, %c0_1] : memref<8x8x32xf32, #tpu.memory_space<vmem>>, vector<8x8x32xf32>
    %1 = vector.shape_cast %0 : vector<8x8x32xf32> to vector<64x32xf32>
    %c0_2 = arith.constant 0 : index
    %c0_3 = arith.constant 0 : index
    %2 = vector.load %arg3[%c0_2, %c0_3] : memref<32x128xf32, #tpu.memory_space<vmem>>, vector<32x128xf32>
    %cst = arith.constant dense<0.000000e+00> : vector<64x128xf32>
    %3 = tpu.matmul %1, %2, %cst {dimension_numbers = #tpu.dot_dimension_numbers<[1], [0], [0], [1], [0, 0, 1, 1], [], []>} : vector<64x32xf32>, vector<32x128xf32>, vector<64x128xf32> -> vector<64x128xf32>
    %4 = vector.shape_cast %3 : vector<64x128xf32> to vector<8x8x128xf32>
    %5 = tpu.iota {dimensions = array<i32: 2>} : vector<1x1x128xi32>
    %c8_i32 = arith.constant 8 : i32
    %6 = vector.broadcast %c8_i32 : i32 to vector<1x1x128xi32>
    %7 = arith.cmpi eq, %5, %6 : vector<1x1x128xi32>
    %cst_4 = arith.constant 0.000000e+00 : f32
    %8 = vector.shape_cast %7 : vector<1x1x128xi1> to vector<1x1x128xi1>
    %9 = vector.broadcast %8 : vector<1x1x128xi1> to vector<8x8x128xi1>
    %10 = vector.broadcast %cst_4 : f32 to vector<8x8x128xf32>
    %11 = arith.select %9, %4, %10 : vector<8x8x128xi1>, vector<8x8x128xf32>
    %cst_5 = arith.constant dense<0.000000e+00> : vector<8x8xf32>
    %12 = vector.multi_reduction <add>, %11, %cst_5 [2] : vector<8x8x128xf32> to vector<8x8xf32>
    %13 = tpu.iota {dimensions = array<i32: 1>} : vector<8x8xi32>
    %c0_6 = arith.constant 0 : index
    %c0_7 = arith.constant 0 : index
    %14 = vector.load %arg2[%c0_6, %c0_7] : memref<8x1xi32, #tpu.memory_space<vmem>>, vector<8x1xi32>
    %15 = vector.broadcast %14 : vector<8x1xi32> to vector<8x8xi32>
    %16 = arith.cmpi slt, %13, %15 : vector<8x8xi32>
    %cst_8 = arith.constant -1.000000e+30 : f32
    %17 = vector.broadcast %cst_8 : f32 to vector<8x8xf32>
    %18 = arith.select %16, %12, %17 : vector<8x8xi1>, vector<8x8xf32>
    %cst_9 = arith.constant dense<0xFF800000> : vector<8xf32>
    %19 = vector.multi_reduction <maximumf>, %18, %cst_9 [1] : vector<8x8xf32> to vector<8xf32>
    %20 = vector.shape_cast %19 : vector<8xf32> to vector<8x1xf32>
    %21 = vector.broadcast %20 : vector<8x1xf32> to vector<8x8xf32>
    %22 = arith.subf %18, %21 : vector<8x8xf32>
    %23 = math.exp %22 : vector<8x8xf32>
    %cst_10 = arith.constant dense<0.000000e+00> : vector<8xf32>
    %24 = vector.multi_reduction <add>, %23, %cst_10 [1] : vector<8x8xf32> to vector<8xf32>
    %25 = vector.shape_cast %24 : vector<8xf32> to vector<8x1xf32>
    %26 = vector.shape_cast %23 : vector<8x8xf32> to vector<8x1x8xf32>
    "tpu.trace_start"() <{level = 10 : i32, message = "bqt,btf->bqf"}> : () -> ()
    %cst_11 = arith.constant dense<0.000000e+00> : vector<8x1x128xf32>
    %27 = tpu.matmul %26, %4, %cst_11 {dimension_numbers = #tpu.dot_dimension_numbers<[2], [1], [1], [2], [0, 0, 0, 1, 1, 2], [0], [0]>} : vector<8x1x8xf32>, vector<8x8x128xf32>, vector<8x1x128xf32> -> vector<8x1x128xf32>
    "tpu.trace_stop"() : () -> ()
    %28 = vector.shape_cast %27 : vector<8x1x128xf32> to vector<8x128xf32>
    %29 = vector.extract_strided_slice %28 {offsets = [0, 0], sizes = [8, 8], strides = [1, 1]} : vector<8x128xf32> to vector<8x8xf32>
    %30 = vector.broadcast %25 : vector<8x1xf32> to vector<8x8xf32>
    %31 = arith.divf %29, %30 : vector<8x8xf32>
    %c0_12 = arith.constant 0 : index
    %c0_13 = arith.constant 0 : index
    %32 = vector.load %arg4[%c0_12, %c0_13] : memref<1x8xf32, #tpu.memory_space<vmem>>, vector<1x8xf32>
    %33 = vector.broadcast %32 : vector<1x8xf32> to vector<8x8xf32>
    %34 = arith.addf %31, %33 : vector<8x8xf32>
    %c0_14 = arith.constant 0 : index
    %c0_15 = arith.constant 0 : index
    %35 = vector.load %arg5[%c0_14, %c0_15] : memref<8x8xf32, #tpu.memory_space<vmem>>, vector<8x8xf32>
    tpu.vector_store %arg5[%c0_14, %c0_15], %34 {strides = array<i32>} : memref<8x8xf32, #tpu.memory_space<vmem>>, vector<8x8xf32>,
    return
  }
  func.func @transform_0(%arg0: i32) -> (i32, i32, i32) {
    %c0_i32 = arith.constant 0 : i32
    %c0_i32_0 = arith.constant 0 : i32
    %c0_i32_1 = arith.constant 0 : i32
    return %arg0, %c0_i32, %c0_i32_0 : i32, i32, i32
  }
  func.func @transform_1(%arg0: i32) -> (i32, i32) {
    %c0_i32 = arith.constant 0 : i32
    %c0_i32_0 = arith.constant 0 : i32
    return %arg0, %c0_i32 : i32, i32
  }
  func.func @transform_2(%arg0: i32) -> (i32, i32) {
    %c0_i32 = arith.constant 0 : i32
    %c0_i32_0 = arith.constant 0 : i32
    %c0_i32_1 = arith.constant 0 : i32
    return %c0_i32, %c0_i32_0 : i32, i32
  }
  func.func @transform_3(%arg0: i32) -> (i32, i32) {
    %c0_i32 = arith.constant 0 : i32
    %c0_i32_0 = arith.constant 0 : i32
    %c0_i32_1 = arith.constant 0 : i32
    return %c0_i32, %c0_i32_0 : i32, i32
  }
  func.func @transform_4(%arg0: i32) -> (i32, i32) {
    %c0_i32 = arith.constant 0 : i32
    %c0_i32_0 = arith.constant 0 : i32
    return %arg0, %c0_i32 : i32, i32
  }
}

</mosaic_0001>

<bundles_post_ra>
// kernel: tpu_custom_call.1
= control target key start
LH: loop header
LB: loop body
LE: loop exit
PB: predicated region body
PF: predicated region fallthrough
CT: control target
= control target key end

     0   :  { %9 = vsyncpa [#allocation3], 0  ;;  %s1351_s0 = inlined_call_operand.hbm [shape: f32[8,8,32], index: 0, kind: input, shape index: {}]   ;;  %s1352_s1 = inlined_call_operand.vmem [shape: s32[8,1], index: 1, kind: input, shape index: {}]   ;;  %s1353_s2 = inlined_call_operand.hbm [shape: f32[32,128], index: 2, kind: input, shape index: {}]   ;;  %s1354_s3 = inlined_call_operand.vmem [shape: f32[1,8], index: 3, kind: input, shape index: {}]   ;;  %s1355_s4 = inlined_call_operand.hbm [shape: f32[8,8], index: 4, kind: output, shape index: {}]  }
   0x1   :  { %10 = vsyncpa [#allocation6], 0 }
   0x2   :  { %11 = vsyncpa [#allocation4], 0  ;;  %s1200_s15 = smov [#allocation2]  }
   0x3   :  { %s17_s16 = sshll.u32 %s1200_s15, 4  ;;  %s18_s16 = int_to_ptr.vmem [resolvable:$true] %s17_s16 }
   0x4   :  { %s1142_s17 = scalar_lea.vmem %s18_s16, 1024  ;;  %p1147_p1 = scmp.lt.s32.totalorder %s18_s16, %s18_s16 }
   0x5   :  { %p1143_p0 = scmp.ne.s32.totalorder %s18_s16, %s1142_s17  ;;  %p1148_p2 = scmp.lt.s32.totalorder %s1142_s17, %s1142_s17 }
   0x7   :  { %p1149_p3 = por %p1148_p2, %p1147_p1 }
   0x9   :  { %p1150_p4 = pnand %p1149_p3, %p1143_p0 }
   0xb   :  { %1153 = shalt.err (!%p1150_p4)
}
   0xc   :  { %s1201_s18 = smov 128   ;;  %s1202_s19 = smov 8  }
   0xd   :  { %23 = dma.hbm_to_vmem [thread:$0]  %s1351_s0, 1024, %s18_s16, [#allocation3], %s1201_s18, %s1201_s18, %s1202_s19  }
   0xe   :  { %s1203_s22 = smov [#allocation5]  }
   0xf   :  { %s31_s23 = sshll.u32 %s1203_s22, 4  ;;  %s32_s23 = int_to_ptr.vmem [resolvable:$true] %s31_s23 }
  0x10   :  { %s1162_s24 = scalar_lea.vmem %s32_s23, 512  ;;  %p1167_p6 = scmp.lt.s32.totalorder %s32_s23, %s32_s23 }
  0x11   :  { %p1163_p5 = scmp.ne.s32.totalorder %s32_s23, %s1162_s24  ;;  %p1168_p7 = scmp.lt.s32.totalorder %s1162_s24, %s1162_s24 }
  0x13   :  { %p1169_p8 = por %p1168_p7, %p1167_p6 }
  0x15   :  { %p1170_p9 = pnand %p1169_p8, %p1163_p5 }
  0x17   :  { %1173 = shalt.err (!%p1170_p9)
}
  0x18   :  { %37 = dma.hbm_to_vmem [thread:$0]  %s1353_s2, 512, %s32_s23, [#allocation6], %s1201_s18, %s1201_s18, %s1202_s19  }
  0x19   :  { %1194 = dma.done.wait [#allocation3], 1024  }
  0x1a   :  { %1195 = vsyncadd [#allocation3], 4294966272 }
  0x1b   :  { %1196 = dma.done.wait [#allocation6], 512  }
  0x1c   :  { %1197 = vsyncadd [#allocation6], 4294966784  ;;  %vm58_vm0 = vcmask 261120   ;;  %v57_v0 = vld [vmem:[#allocation5 + $0x18] sm:$0xff]  ;;  %v56_v1 = vld [vmem:[#allocation5 + $0x10] sm:$0xff]  ;;  %v1204_v12 = vmov 0.0   ;;  %v188_v14 = vlaneseq }
  0x1d   :  { %1046 = vmatprep.subr.mxu0 %v57_v0  ;;  %v46_v2 = vld [vmem:[#allocation2] sm:$0xff]  ;;  %v55_v3 = vld [vmem:[#allocation5 + $0x8] sm:$0xff]  ;;  %v48_v6 = vld [vmem:[#allocation2 + $0x10] sm:$0xff]  ;;  %1066 = vmatprep.subr.mxu1 %v1204_v12  ;;  %v1205_v13 = vmov 0   ;;  %vm262_vm2 = vcmask 1041409   ;;  %vm264_vm3 = vcmask 1042434  }
  0x1e   :  { %1047 = vmatpush3.msra.mxu0 %v57_v0  ;;  %1054 = vmatprep.mubr.msk.f32.mxu0 %vm58_vm0, %v46_v2  ;;  %v54_v4 = vld [vmem:[#allocation5] sm:$0xff]  ;;  %v47_v5 = vld [vmem:[#allocation2 + $0x8] sm:$0xff]  ;;  %v49_v7 = vld [vmem:[#allocation2 + $0x18] sm:$0xff]  ;;  %v1250_v15 = vand.u32 127, %v188_v14  ;;  %v231_v33 = vshrl.u32 %v188_v14, 7  ;;  %vm266_vm4 = vcmask 1043459  }
  0x1f   :  { %1048 = vmatprep.subr.mxu0 %v56_v1  ;;  %v50_v8 = vld [vmem:[#allocation2 + $0x20] sm:$0xff]  ;;  %v51_v9 = vld [vmem:[#allocation2 + $0x28] sm:$0xff]  ;;  %v52_v10 = vld [vmem:[#allocation2 + $0x30] sm:$0xff]  ;;  %1115 = vset.pattern.permute.xlu0 %v1205_v13  ;;  %vm268_vm5 = vcmask 1044484   ;;  %vm270_vm6 = vcmask 1045509   ;;  %vm272_vm7 = vcmask 1046534  }
  0x20   :  { %1049 = vmatpush3.msra.mxu0 %v56_v1  ;;  %v53_v11 = vld [vmem:[#allocation2 + $0x38] sm:$0xff]  ;;  %vm190_vm1 = vcmp.eq.s32.totalorder %v1250_v15, 8  ;;  %v217_v32 = vld [vmem:[%s1352_s1] sm:$0xff]  ;;  %v232_v35 = vsub.s32 %v1250_v15, %v231_v33  ;;  %vm274_vm8 = vcmask 1047559   ;;  %vm278_vm9 = vcmask 64512  }
  0x21   :  { %1050 = vmatprep.subr.mxu0 %v55_v3  ;;  %vm1206_vm11 = vmmov 0   ;;  %v1207_v0 = vmov 1966171168  }
  0x22   :  { %1051 = vmatpush3.msra.mxu0 %v55_v3  ;;  %1068 = vmatprep.mubr.msk.f32.mxu1 %vm1206_vm11, %v1204_v12  ;;  %v291_v1 = vunpack.c.l.s4 %v1207_v0 }
  0x23   :  { %1052 = vmatprep.subr.mxu0 %v54_v4 }
  0x24   :  { %1053 = vmatpush3.msra.mxu0 %v54_v4  ;;  %v292_v2 = vunpack.c.0.s8 %v291_v1 }
  0x25   :  { %1055 = vmatmul.mubr.msk.f32.vlgmr.msra.gmra.mxu0 %vm58_vm0, %v47_v5  ;;  %1096 = vmatprep.subr.mxu0 %v1204_v12 }
  0x26   :  { %1057 = vmatprep.mubr.msk.f32.mxu0 %vm58_vm0, %v48_v6  ;;  %v295_v3 = vsub.s32 %v292_v2, %v231_v33 }
  0x29   :  { %1058 = vmatmul.mubr.msk.f32.gmra.mxu0 %vm58_vm0, %v49_v7 }
  0x2a   :  { %1060 = vmatprep.mubr.msk.f32.mxu0 %vm58_vm0, %v50_v8 }
  0x2d   :  { %1061 = vmatmul.mubr.msk.f32.gmra.mxu0 %vm58_vm0, %v51_v9 }
  0x2e   :  { %1063 = vmatprep.mubr.msk.f32.mxu0 %vm58_vm0, %v52_v10 }
  0x31   :  { %1064 = vmatmul.mubr.msk.f32.gmra.mxu0 %vm58_vm0, %v53_v11 }
  0x32   :  { %1098 = vmatprep.mubr.msk.f32.mxu0 %vm1206_vm11, %v1204_v12 }
  0xe5   :  { %v1253_v16 = vpop.f32.mrf.mxu0 }
  0xe6   :  { %v194_v17 = vsel %vm190_vm1, %v1253_v16, 0.0 }
  0xe7   :  { %203 = vadd.xlane.f32.xlu0 %v194_v17  ;;  %v149_v18 = vpop.f32.mrf.mxu0 }
  0xe8   :  { %1067 = vmatpush3.msra.mxu1 %v149_v18  ;;  %v193_v20 = vsel %vm190_vm1, %v149_v18, 0.0 }
  0xe9   :  { %v1258_v19 = vpop.f32.mrf.mxu0  ;;  %1071 = vmatprep.subr.mxu1 %v1204_v12 }
  0xea   :  { %v196_v21 = vsel %vm190_vm1, %v1258_v19, 0.0 }
  0xeb   :  { %201 = vadd.xlane.f32.xlu0 %v193_v20  ;;  %207 = vadd.xlane.f32.xlu1 %v196_v21  ;;  %v1266_v22 = vpop.f32.mrf.mxu0 }
  0xec   :  { %v195_v24 = vsel %vm190_vm1, %v1266_v22, 0.0 }
  0xed   :  { %v1268_v23 = vpop.f32.mrf.mxu0 }
  0xee   :  { %v198_v28 = vsel %vm190_vm1, %v1268_v23, 0.0 }
  0xef   :  { %205 = vadd.xlane.f32.xlu1 %v195_v24  ;;  %v1273_v25 = vpop.f32.mrf.mxu0 }
  0xf0   :  { %v197_v26 = vsel %vm190_vm1, %v1273_v25, 0.0 }
  0xf1   :  { %209 = vadd.xlane.f32.xlu0 %v197_v26  ;;  %v1278_v27 = vpop.f32.mrf.mxu0 }
  0xf2   :  { %v200_v31 = vsel %vm190_vm1, %v1278_v27, 0.0 }
  0xf3   :  { %211 = vadd.xlane.f32.xlu1 %v198_v28  ;;  %v179_v29 = vpop.f32.mrf.mxu0 }
  0xf4   :  { %1097 = vmatpush3.msra.mxu0 %v179_v29  ;;  %v199_v30 = vsel %vm190_vm1, %v179_v29, 0.0 }
  0xf5   :  { %213 = vadd.xlane.f32.xlu0 %v199_v30 }
  0xf7   :  { %215 = vadd.xlane.f32.xlu1 %v200_v31 }
 0x10b   :  { %219 = vperm.xlu0 %1115, %v217_v32  }
 0x170   :  { %v204_v34 = vpop.xlane.xlu0 %203 }
 0x171   :  { %v237_v39 = vrot.slane %v204_v34, %v232_v35 }
 0x174   :  { %v202_v36 = vpop.xlane.xlu0 %201  ;;  %v208_v37 = vpop.xlane.xlu1 %207 }
 0x175   :  { %v233_v38 = vrot.slane %v202_v36, %v232_v35  ;;  %v245_v43 = vrot.slane %v208_v37, %v232_v35 }
 0x177   :  { %v263_v42 = vsel %vm262_vm2, %v237_v39, %v233_v38 }
 0x178   :  { %v206_v40 = vpop.xlane.xlu1 %205 }
 0x179   :  { %v241_v41 = vrot.slane %v206_v40, %v232_v35 }
 0x17a   :  { %v210_v44 = vpop.xlane.xlu0 %209 }
 0x17b   :  { %v265_v45 = vsel %vm264_vm3, %v241_v41, %v263_v42  ;;  %v249_v46 = vrot.slane %v210_v44, %v232_v35  ;;  %v1017_v42 = vld [vmem:[%s1354_s3] ss:$0 sm:$0xff]  ;;  %s1208_s3 = smov [#allocation7]  }
 0x17c   :  { %v267_v47 = vsel %vm266_vm4, %v245_v43, %v265_v45  ;;  %v212_v48 = vpop.xlane.xlu1 %211  ;;  %s991_s28 = sshll.u32 %s1208_s3, 4  ;;  %s992_s28 = int_to_ptr.vmem [resolvable:$true] %s991_s28 }
 0x17d   :  { %v253_v49 = vrot.slane %v212_v48, %v232_v35  ;;  %v269_v50 = vsel %vm268_vm5, %v249_v46, %v267_v47  ;;  %s1174_s29 = scalar_lea.vmem %s992_s28, 128  ;;  %p1179_p11 = scmp.lt.s32.totalorder %s992_s28, %s992_s28 }
 0x17e   :  { %v214_v51 = vpop.xlane.xlu0 %213  ;;  %p1175_p10 = scmp.ne.s32.totalorder %s992_s28, %s1174_s29  ;;  %p1180_p12 = scmp.lt.s32.totalorder %s1174_s29, %s1174_s29 }
 0x17f   :  { %v257_v52 = vrot.slane %v214_v51, %v232_v35  ;;  %v271_v54 = vsel %vm270_vm6, %v253_v49, %v269_v50 }
 0x180   :  { %v216_v53 = vpop.xlane.xlu1 %215  ;;  %p1181_p13 = por %p1180_p12, %p1179_p11 }
 0x181   :  { %v261_v55 = vrot.slane %v216_v53, %v232_v35  ;;  %v273_v56 = vsel %vm272_vm7, %v257_v52, %v271_v54 }
 0x182   :  { %p1182_p0 = pnand %p1181_p13, %p1175_p10 }
 0x183   :  { %v275_v58 = vsel %vm274_vm8, %v261_v55, %v273_v56 }
 0x186   :  { %v220_v57 = vpop.permute.xlu0 %219 }
 0x187   :  { %vm221_vm10 = vcmp.lt.s32.totalorder %v1250_v15, %v220_v57 }
 0x188   :  { %v277_v59 = vsel %vm221_vm10, %v275_v58, -1e+30 }
 0x189   :  { %v279_v60 = vsel %vm278_vm9, %v277_v59, -inf }
 0x18a   :  { %280 = vmax.xlane.f32.xlu1 %v279_v60 }
 0x213   :  { %v281_v61 = vpop.xlane.xlu1 %280 }
 0x214   :  { %v282_v62 = vsub.f32 %v277_v59, %v281_v61 }
 0x216   :  { %v283_v63 = vmul.f32 1.442695, %v282_v62 }
 0x218   :  { %1116 = vpow2.f32 %v283_v63 }
 0x225   :  { %v1117_v4 = vpop.eup %1116 }
 0x226   :  { %v285_v5 = vsel %vm278_vm9, %v1117_v4, 0.0  ;;  %v296_v6 = vrot.slane %v1117_v4, %v295_v3  ;;  %v289_v7 = vcombine.high %v1117_v4, %v1117_v4 }
 0x227   :  { %286 = vadd.xlane.f32.xlu1 %v285_v5 }
 0x228   :  { %v304_v8 = vcombine.high %v296_v6, %v296_v6  ;;  %v312_v9 = vrot.slane %v296_v6, %v295_v3  ;;  %v303_v10 = vrot.slane %v289_v7, %v295_v3 }
 0x22a   :  { %1069 = vmatmul.mubr.msk.f32.vlgmr.msra.gmra.mxu1 %vm278_vm9, %v312_v9  ;;  %v319_v11 = vrot.slane %v303_v10, %v295_v3  ;;  %v326_v13 = vrot.slane %v304_v8, %v295_v3  ;;  %v334_v15 = vcombine.high %v312_v9, %v312_v9  ;;  %v305_v17 = vcombine.high %v303_v10, %v303_v10 }
 0x22b   :  { %1072 = vmatpush3.msra.mxu1 %v1253_v16  ;;  %1073 = vmatprep.mubr.msk.f32.mxu1 %vm1206_vm11, %v1204_v12 }
 0x22c   :  { %1076 = vmatprep.subr.mxu1 %v1204_v12  ;;  %v335_v14 = vcombine.high %v319_v11, %v319_v11  ;;  %v336_v16 = vcombine.high %v326_v13, %v326_v13  ;;  %v333_v18 = vrot.slane %v305_v17, %v295_v3 }
 0x22e   :  { %1074 = vmatmul.mubr.msk.f32.vlgmr.msra.gmra.mxu1 %vm278_vm9, %v326_v13  ;;  %1099 = vmatmul.mubr.msk.f32.vlgmr.msra.gmra.mxu0 %vm278_vm9, %v335_v14 }
 0x22f   :  { %1077 = vmatpush3.msra.mxu1 %v1266_v22  ;;  %1078 = vmatprep.mubr.msk.f32.mxu1 %vm1206_vm11, %v1204_v12 }
 0x230   :  { %1081 = vmatprep.subr.mxu1 %v1204_v12 }
 0x232   :  { %1079 = vmatmul.mubr.msk.f32.vlgmr.msra.gmra.mxu1 %vm278_vm9, %v334_v15 }
 0x233   :  { %1082 = vmatpush3.msra.mxu1 %v1258_v19  ;;  %1083 = vmatprep.mubr.msk.f32.mxu1 %vm1206_vm11, %v1204_v12  ;;  %v337_v19 = vcombine.high %v333_v18, %v333_v18 }
 0x234   :  { %1086 = vmatprep.subr.mxu1 %v1204_v12 }
 0x236   :  { %1084 = vmatmul.mubr.msk.f32.vlgmr.msra.gmra.mxu1 %vm278_vm9, %v336_v16 }
 0x237   :  { %1087 = vmatpush3.msra.mxu1 %v1273_v25  ;;  %1088 = vmatprep.mubr.msk.f32.mxu1 %vm1206_vm11, %v1204_v12 }
 0x238   :  { %1091 = vmatprep.subr.mxu1 %v1204_v12 }
 0x23a   :  { %1089 = vmatmul.mubr.msk.f32.vlgmr.msra.gmra.mxu1 %vm278_vm9, %v319_v11 }
 0x23b   :  { %1092 = vmatpush3.msra.mxu1 %v1268_v23  ;;  %1093 = vmatprep.mubr.msk.f32.mxu1 %vm1206_vm11, %v1204_v12 }
 0x23c   :  { %1101 = vmatprep.subr.mxu1 %v1204_v12 }
 0x23e   :  { %1094 = vmatmul.mubr.msk.f32.vlgmr.msra.gmra.mxu1 %vm278_vm9, %v333_v18 }
 0x23f   :  { %1102 = vmatpush3.msra.mxu1 %v1278_v27  ;;  %1103 = vmatprep.mubr.msk.f32.mxu1 %vm1206_vm11, %v1204_v12 }
 0x242   :  { %1104 = vmatmul.mubr.msk.f32.vlgmr.msra.gmra.mxu1 %vm278_vm9, %v337_v19 }
 0x2b0   :  { %v287_v20 = vpop.xlane.xlu1 %286 }
 0x2b1   :  { %v915_v21 = vrot.slane %v287_v20, 1  ;;  %v916_v22 = vrot.slane %v287_v20, 2  ;;  %v917_v23 = vrot.slane %v287_v20, 3  ;;  %v918_v24 = vrot.slane %v287_v20, 4 }
 0x2b2   :  { %v920_v28 = vrot.slane %v287_v20, 6  ;;  %v919_v27 = vrot.slane %v287_v20, 5  ;;  %v921_v32 = vrot.slane %v287_v20, 7 }
 0x2b3   :  { %1118 = vrcp.f32 %v915_v21 }
 0x2b4   :  { %1120 = vrcp.f32 %v916_v22 }
 0x2b5   :  { %1122 = vrcp.f32 %v917_v23 }
 0x2b6   :  { %1124 = vrcp.f32 %v287_v20 }
 0x2b7   :  { %1126 = vrcp.f32 %v918_v24 }
 0x2b8   :  { %1128 = vrcp.f32 %v920_v28 }
 0x2b9   :  { %1130 = vrcp.f32 %v919_v27 }
 0x2ba   :  { %1132 = vrcp.f32 %v921_v32 }
 0x2c0   :  { %v1119_v34 = vpop.eup %1118 }
 0x2c1   :  { %v1121_v36 = vpop.eup %1120 }
 0x2c2   :  { %v1123_v38 = vpop.eup %1122 }
 0x2c3   :  { %v1125_v44 = vpop.eup %1124 }
 0x2c4   :  { %v1127_v46 = vpop.eup %1126 }
 0x2c5   :  { %v1129_v53 = vpop.eup %1128 }
 0x2c6   :  { %v1131_v56 = vpop.eup %1130 }
 0x2c7   :  { %v1133_v3 = vpop.eup %1132 }
 0x2ea   :  { %v406_v25 = vpop.f32.mrf.mxu1 }
 0x2eb   :  { %v931_v49 = vmul.f32 %v1125_v44, %v406_v25 }
 0x2ec   :  { %v1070_v26 = vpop.f32.mrf.mxu1 }
 0x2ed   :  { %v953_v60 = vadd.f32 %v1017_v42, %v931_v49 }
 0x2ee   :  { %v478_v29 = vpop.f32.mrf.mxu1  ;;  %v838_v30 = vpop.f32.mrf.mxu0 }
 0x2ef   :  { %v933_v37 = vmul.f32 %v1119_v34, %v478_v29  ;;  %v943_v57 = vmul.f32 %v1129_v53, %v838_v30 }
 0x2f0   :  { %v1075_v12 = vpop.f32.mrf.mxu1  ;;  %v1100_v31 = vpop.f32.mrf.mxu0 }
 0x2f1   :  { %v954_v45 = vadd.f32 %v1017_v42, %v933_v37  ;;  %v959_v4 = vadd.f32 %v1017_v42, %v943_v57 }
 0x2f2   :  { %v550_v33 = vpop.f32.mrf.mxu1 }
 0x2f3   :  { %v935_v39 = vmul.f32 %v1121_v36, %v550_v33  ;;  %v969_v54 = vrot.slane %v954_v45, 7  ;;  %v979_v15 = vrot.slane %v959_v4, 2 }
 0x2f4   :  { %v1080_v35 = vpop.f32.mrf.mxu1 }
 0x2f5   :  { %v955_v47 = vadd.f32 %v1017_v42, %v935_v39  ;;  %v970_v1 = vsel %vm262_vm2, %v969_v54, %v953_v60 }
 0x2f6   :  { %v622_v40 = vpop.f32.mrf.mxu1 }
 0x2f7   :  { %v937_v41 = vmul.f32 %v1123_v38, %v622_v40  ;;  %v971_v58 = vrot.slane %v955_v47, 6 }
 0x2f8   :  { %v1085_v43 = vpop.f32.mrf.mxu1 }
 0x2f9   :  { %v956_v50 = vadd.f32 %v1017_v42, %v937_v41  ;;  %v972_v5 = vsel %vm264_vm3, %v971_v58, %v970_v1 }
 0x2fa   :  { %v694_v48 = vpop.f32.mrf.mxu1 }
 0x2fb   :  { %v939_v51 = vmul.f32 %v1127_v46, %v694_v48  ;;  %v973_v61 = vrot.slane %v956_v50, 5 }
 0x2fc   :  { %v1090_v52 = vpop.f32.mrf.mxu1 }
 0x2fd   :  { %v957_v55 = vadd.f32 %v1017_v42, %v939_v51  ;;  %v974_v7 = vsel %vm266_vm4, %v973_v61, %v972_v5 }
 0x2fe   :  { %v766_v59 = vpop.f32.mrf.mxu1 }
 0x2ff   :  { %v941_v62 = vmul.f32 %v1131_v56, %v766_v59  ;;  %v975_v63 = vrot.slane %v957_v55, 4 }
 0x300   :  { %v1095_v0 = vpop.f32.mrf.mxu1 }
 0x301   :  { %v958_v2 = vadd.f32 %v1017_v42, %v941_v62  ;;  %v976_v10 = vsel %vm268_vm5, %v975_v63, %v974_v7 }
 0x302   :  { %v910_v6 = vpop.f32.mrf.mxu1 }
 0x303   :  { %v977_v8 = vrot.slane %v958_v2, 3  ;;  %v945_v9 = vmul.f32 %v1133_v3, %v910_v6 }
 0x304   :  { %v1105_v11 = vpop.f32.mrf.mxu1 }
 0x305   :  { %v978_v13 = vsel %vm270_vm6, %v977_v8, %v976_v10  ;;  %v960_v14 = vadd.f32 %v1017_v42, %v945_v9 }
 0x306   :  { %v980_v17 = vsel %vm272_vm7, %v979_v15, %v978_v13 }
 0x307   :  { %v981_v16 = vrot.slane %v960_v14, 1 }
 0x309   :  { %v982_v18 = vsel %vm274_vm8, %v981_v16, %v980_v17 }
 0x30a   :  { %984 = vst.msk [vmem:[#allocation7] sm:$0xff] %vm278_vm9, %v982_v18 }
 0x30b   :  { %1185 = shalt.err (!%p1182_p0)
}
 0x30c   :  { %994 = dma.vmem_to_hbm [thread:$0]  %s992_s28, 128, %s1355_s4, [#allocation4]  }
 0x30d   :  { %1198 = dma.done.wait [#allocation4], 128  }
 0x30e   :  { %1199 = vsyncadd [#allocation4], 4294967168 }
 0x30f   :  { %998 = vsyncpa [#allocation3], 1 }
 0x310   :  { %999 = vsyncpa [#allocation6], 1 }
 0x311   :  { %1000 = vsyncpa [#allocation4], 1 }

</bundles_post_ra>
